<compile_context>
chip_gen: v6e
topology: v6e:2x2x1
jax: 0.10.0
libtpu: 0.0.40
codegen_flags: <defaults>
</compile_context>

<pallas_src>
import functools
import math

import numpy as np
import jax
import jax.numpy as jnp
from jax import lax
from jax.experimental import pallas as pl
from jax.experimental.pallas import tpu as pltpu


# --------------------------------------------------------------------------- #
# Host-side parameter sampling (replica of RandomResizedCrop.get_params).
# --------------------------------------------------------------------------- #
def _get_params(height, width, scale, ratio, rng):
    area = height * width
    for _ in range(10):
        target_area = area * rng.uniform(scale[0], scale[1])
        log_ratio = (math.log(ratio[0]), math.log(ratio[1]))
        aspect_ratio = math.exp(rng.uniform(log_ratio[0], log_ratio[1]))
        w = int(round(math.sqrt(target_area * aspect_ratio)))
        h = int(round(math.sqrt(target_area / aspect_ratio)))
        if 0 < w <= width and 0 < h <= height:
            i = int(rng.integers(0, height - h + 1))
            j = int(rng.integers(0, width - w + 1))
            return i, j, h, w
    # fallback: central crop
    in_ratio = float(width) / float(height)
    if in_ratio < min(ratio):
        w = width
        h = int(round(w / min(ratio)))
    elif in_ratio > max(ratio):
        h = height
        w = int(round(h * max(ratio)))
    else:
        w = width
        h = height
    i = (height - h) // 2
    j = (width - w) // 2
    return i, j, h, w


def _round_up(a, b):
    return (a + b - 1) // b * b


def _bilinear_weight_matrix(full_size, crop_start, crop_len, out_len):
    """W [out_len, full_size]: applying W along an axis == crop the window
    [crop_start, crop_start+crop_len) then bilinear resize with
    align_corners=False (torch F.interpolate, antialias=False)."""
    W = np.zeros((out_len, full_size), dtype=np.float32)
    scale = crop_len / out_len
    for o in range(out_len):
        src = (o + 0.5) * scale - 0.5
        src = max(src, 0.0)
        x0 = min(int(math.floor(src)), crop_len - 1)
        x1 = min(x0 + 1, crop_len - 1)
        w1 = src - x0
        w0 = 1.0 - w1
        W[o, crop_start + x0] += w0
        W[o, crop_start + x1] += w1
    return W


# --------------------------------------------------------------------------- #
# Generation-aware VMEM budgeting.
# --------------------------------------------------------------------------- #
def _vmem_capacity_bytes():
    try:
        return int(pltpu.get_tpu_info().vmem_capacity_bytes)
    except Exception:
        return 64 * 1024 * 1024        # conservative fallback (v7x per-TC VMEM)


def _vmem_tile_bytes(rows, cols, itemsize):
    sub = max(8, 32 // itemsize)       # sublane packing: f32 -> 8, bf16 -> 16
    return _round_up(max(rows, 1), sub) * _round_up(max(cols, 1), 128) * itemsize


def _choose_tp(nc, per_plane_bytes, weight_bytes, vmem_cap):
    """Planes per grid step: generation-aware VMEM budget, >= ~8 grid steps for
    large NC (v7x's 2 TCs + pipeline depth, cheap on 1-TC chips too), and
    tp | nc so the output tiling is exact (no plane padding, no post-slice)."""
    budget = int(vmem_cap * 0.5) - 2 * weight_bytes
    tp = max(1, budget // max(per_plane_bytes, 1))
    if nc >= 64:
        tp = min(tp, max(1, nc // 8))
    elif nc >= 2:
        tp = min(tp, (nc + 1) // 2)
    tp = max(1, min(tp, nc))
    while nc % tp:
        tp -= 1
    return tp


# --------------------------------------------------------------------------- #
# Pallas kernel: per plane, fused (width GEMM -> height GEMM); the
# intermediate never leaves vregs / compiler-managed VMEM (no scratch ref).
# --------------------------------------------------------------------------- #
def _crop_resize_kernel(wy_ref, wxt_ref, img_ref, out_ref, *, width_first, unroll):
    # wy_ref  : (OH, R)     bf16  vertical crop+resize weights (shared block)
    # wxt_ref : (C,  OW)    bf16  horizontal crop+resize weights, pre-transposed
    # img_ref : (tp, R, C)        planes for this grid step (f32 full / bf16 crop)
    # out_ref : (tp, OH, OW)      output planes
    tp = img_ref.shape[0]
    wy = wy_ref[...]
    wxt = wxt_ref[...]

    def one_plane(p):
        plane = img_ref[p].astype(jnp.bfloat16)                                # (R, C)
        if width_first:
            t = jnp.dot(plane, wxt, preferred_element_type=jnp.float32)        # (R, OW)
            o = jnp.dot(wy, t.astype(jnp.bfloat16),
                        preferred_element_type=jnp.float32)                    # (OH, OW)
        else:
            t = jnp.dot(wy, plane, preferred_element_type=jnp.float32)         # (OH, C)
            o = jnp.dot(t.astype(jnp.bfloat16), wxt,
                        preferred_element_type=jnp.float32)                    # (OH, OW)
        out_ref[p] = o.astype(out_ref.dtype)

    if tp == 1:
        one_plane(0)
    else:
        def body(p, carry):
            one_plane(p)
            return carry
        lax.fori_loop(0, tp, body, 0, unroll=min(tp, unroll))


# --------------------------------------------------------------------------- #
# Wrapper
# --------------------------------------------------------------------------- #
def random_resized_crop(x, size, scale=(0.08, 1.0), ratio=(3.0 / 4.0, 4.0 / 3.0),
                        seed=0, out_dtype=None):
    """x: (N, C, H, W) -> (N, C, size[0], size[1]); bilinear, align_corners=False."""
    N, C, H, W = x.shape
    if isinstance(size, int):
        OH = OW = size
    else:
        OH, OW = size
    out_dtype = x.dtype if out_dtype is None else np.dtype(out_dtype)

    rng = np.random.default_rng(seed)
    i, j, h, w = _get_params(H, W, scale, ratio, rng)

    NC = N * C
    in_itemsize = np.dtype(x.dtype).itemsize
    out_itemsize = np.dtype(out_dtype).itemsize

    # Input strategy (the crop window is static, so both are exact):
    #  (a) bake the crop into the weight matrices and stream full planes from x
    #      (zero host-side pre-pass; reshape is metadata-only), or
    #  (b) if the crop is small, materialize a bf16 crop host-side (one fused
    #      slice+cast XLA pass, no jnp.pad) so the kernel reads only crop bytes.
    full_path_bytes = H * W * in_itemsize                # kernel read / plane
    crop_path_bytes = h * w * (in_itemsize + 2 + 2)      # slice read + bf16 write + kernel read
    use_full_planes = full_path_bytes <= crop_path_bytes

    if use_full_planes:
        img = x.reshape(NC, H, W)                        # free (metadata only)
        R, Ccols = H, W
        wy_np = _bilinear_weight_matrix(H, i, h, OH)     # (OH, H) crop baked in
        wx_np = _bilinear_weight_matrix(W, j, w, OW)     # (OW, W) crop baked in
    else:
        img = x[:, :, i:i + h, j:j + w].astype(jnp.bfloat16).reshape(NC, h, w)
        R, Ccols = h, w
        wy_np = _bilinear_weight_matrix(h, 0, h, OH)     # (OH, h)
        wx_np = _bilinear_weight_matrix(w, 0, w, OW)     # (OW, w)

    wy = jnp.asarray(wy_np, dtype=jnp.bfloat16)                               # (OH, R)
    wxt = jnp.asarray(np.ascontiguousarray(wx_np.T), dtype=jnp.bfloat16)      # (Ccols, OW)

    # Contraction order by FLOPs (intermediate stays in vregs either way).
    width_first = R * OW * (Ccols + OH) <= OH * Ccols * (R + OW)

    # Planes per grid step, sized against this generation's VMEM.
    vmem_cap = _vmem_capacity_bytes()
    img_itemsize = np.dtype(img.dtype).itemsize
    in_plane = _vmem_tile_bytes(R, Ccols, img_itemsize)
    out_plane = _vmem_tile_bytes(OH, OW, out_itemsize)
    weight_bytes = _vmem_tile_bytes(OH, R, 2) + _vmem_tile_bytes(Ccols, OW, 2)
    per_plane = 2 * (in_plane + out_plane)               # double-buffered input + output
    tp = _choose_tp(NC, per_plane, weight_bytes, vmem_cap)

    vmem_limit = int(min(vmem_cap * 0.85,
                         max(vmem_cap * 0.6,
                             tp * per_plane + 2 * weight_bytes + (4 << 20))))

    kernel = functools.partial(_crop_resize_kernel,
                               width_first=width_first, unroll=4)

    out = pl.pallas_call(
        kernel,
        out_shape=jax.ShapeDtypeStruct((NC, OH, OW), out_dtype),
        grid=(NC // tp,),
        in_specs=[
            pl.BlockSpec((OH, R), lambda p: (0, 0)),             # Wy     (shared)
            pl.BlockSpec((Ccols, OW), lambda p: (0, 0)),         # Wx^T   (shared)
            pl.BlockSpec((tp, R, Ccols), lambda p: (p, 0, 0)),   # tp planes
        ],
        out_specs=pl.BlockSpec((tp, OH, OW), lambda p: (p, 0, 0)),
        compiler_params=pltpu.CompilerParams(
            dimension_semantics=("parallel",),
            vmem_limit_bytes=vmem_limit,
        ),
    )(wy, wxt, img)

    # Exact output from the kernel -> only a free metadata reshape remains.
    return out.reshape(N, C, OH, OW)


if __name__ == "__main__":
    key = jax.random.PRNGKey(0)
    N, C, H, W = 2, 4, 16, 16
    OH = OW = 8
    x = jax.random.normal(key, (N, C, H, W), dtype=jnp.float32)

    out = random_resized_crop(x, size=(OH, OW), seed=0)
    out = jax.block_until_ready(out)

    assert out.shape == (N, C, OH, OW), out.shape
    assert out.dtype == jnp.float32, out.dtype
    assert bool(jnp.all(jnp.isfinite(out)))

    # f32 reference through the same linear formulation (same seeded crop);
    # tolerance covers the bf16 GEMM inputs.
    rng = np.random.default_rng(0)
    i, j, h, w = _get_params(H, W, (0.08, 1.0), (3.0 / 4.0, 4.0 / 3.0), rng)
    wy_ref = _bilinear_weight_matrix(h, 0, h, OH)
    wx_ref = _bilinear_weight_matrix(w, 0, w, OW)
    xc = np.asarray(x)[:, :, i:i + h, j:j + w].astype(np.float32)
    ref = np.einsum('oy,ncyx,px->ncop', wy_ref, xc, wx_ref)
    max_err = float(np.max(np.abs(np.asarray(out) - ref)))
    assert max_err < 0.1, f"max abs error vs f32 reference: {max_err}"

    print("KERNEL_OK")
</pallas_src>

<mosaic_0001>
module attributes {stable_mosaic.version = 11 : i64} {
  func.func @_crop_resize_kernel(%arg0: i32, %arg1: memref<8x16xbf16, #tpu.memory_space<vmem>>, %arg2: memref<16x8xbf16, #tpu.memory_space<vmem>>, %arg3: memref<4x16x16xf32, #tpu.memory_space<vmem>>, %arg4: memref<4x8x8xf32, #tpu.memory_space<vmem>>) attributes {dimension_semantics = [#tpu.dimension_semantics<parallel>], iteration_bounds = array<i64: 2>, scalar_prefetch = 0 : i64, scratch_operands = 0 : i64, tpu.core_type = #tpu.core_type<tc>, window_params = [{pipeline_mode = #tpu.pipeline_mode<synchronous>, transform_indices = @transform_0, window_bounds = array<i64: 8, 16>}, {pipeline_mode = #tpu.pipeline_mode<synchronous>, transform_indices = @transform_1, window_bounds = array<i64: 16, 8>}, {transform_indices = @transform_2, window_bounds = array<i64: 4, 16, 16>}, {transform_indices = @transform_3, window_bounds = array<i64: 4, 8, 8>}]} {
    %c0 = arith.constant 0 : index
    %c0_0 = arith.constant 0 : index
    %0 = vector.load %arg1[%c0, %c0_0] : memref<8x16xbf16, #tpu.memory_space<vmem>>, vector<8x16xbf16>
    %c0_1 = arith.constant 0 : index
    %c0_2 = arith.constant 0 : index
    %1 = vector.load %arg2[%c0_1, %c0_2] : memref<16x8xbf16, #tpu.memory_space<vmem>>, vector<16x8xbf16>
    %c0_i32 = arith.constant 0 : i32
    %2 = arith.index_cast %c0_i32 : i32 to index
    %c0_3 = arith.constant 0 : index
    %c0_4 = arith.constant 0 : index
    %3 = vector.load %arg3[%2, %c0_3, %c0_4] : memref<4x16x16xf32, #tpu.memory_space<vmem>>, vector<1x16x16xf32>
    %4 = vector.shape_cast %3 : vector<1x16x16xf32> to vector<16x16xf32>
    %5 = arith.truncf %4 : vector<16x16xf32> to vector<16x16xbf16>
    %cst = arith.constant dense<0.000000e+00> : vector<16x8xf32>
    %6 = tpu.matmul %5, %1, %cst {dimension_numbers = #tpu.dot_dimension_numbers<[1], [0], [0], [1], [0, 0, 1, 1], [], []>} : vector<16x16xbf16>, vector<16x8xbf16>, vector<16x8xf32> -> vector<16x8xf32>
    %7 = arith.truncf %6 : vector<16x8xf32> to vector<16x8xbf16>
    %cst_5 = arith.constant dense<0.000000e+00> : vector<8x8xf32>
    %8 = tpu.matmul %0, %7, %cst_5 {dimension_numbers = #tpu.dot_dimension_numbers<[1], [0], [0], [1], [0, 0, 1, 1], [], []>} : vector<8x16xbf16>, vector<16x8xbf16>, vector<8x8xf32> -> vector<8x8xf32>
    %9 = arith.index_cast %c0_i32 : i32 to index
    %c0_6 = arith.constant 0 : index
    %c0_7 = arith.constant 0 : index
    %10 = vector.load %arg4[%9, %c0_6, %c0_7] : memref<4x8x8xf32, #tpu.memory_space<vmem>>, vector<1x8x8xf32>
    %11 = vector.shape_cast %10 : vector<1x8x8xf32> to vector<8x8xf32>
    %12 = vector.shape_cast %8 : vector<8x8xf32> to vector<1x8x8xf32>
    tpu.vector_store %arg4[%9, %c0_6, %c0_7], %12 {strides = array<i32>} : memref<4x8x8xf32, #tpu.memory_space<vmem>>, vector<1x8x8xf32>,
    %c1_i32 = arith.constant 1 : i32
    %13 = arith.index_cast %c1_i32 : i32 to index
    %c0_8 = arith.constant 0 : index
    %c0_9 = arith.constant 0 : index
    %14 = vector.load %arg3[%13, %c0_8, %c0_9] : memref<4x16x16xf32, #tpu.memory_space<vmem>>, vector<1x16x16xf32>
    %15 = vector.shape_cast %14 : vector<1x16x16xf32> to vector<16x16xf32>
    %16 = arith.truncf %15 : vector<16x16xf32> to vector<16x16xbf16>
    %cst_10 = arith.constant dense<0.000000e+00> : vector<16x8xf32>
    %17 = tpu.matmul %16, %1, %cst_10 {dimension_numbers = #tpu.dot_dimension_numbers<[1], [0], [0], [1], [0, 0, 1, 1], [], []>} : vector<16x16xbf16>, vector<16x8xbf16>, vector<16x8xf32> -> vector<16x8xf32>
    %18 = arith.truncf %17 : vector<16x8xf32> to vector<16x8xbf16>
    %cst_11 = arith.constant dense<0.000000e+00> : vector<8x8xf32>
    %19 = tpu.matmul %0, %18, %cst_11 {dimension_numbers = #tpu.dot_dimension_numbers<[1], [0], [0], [1], [0, 0, 1, 1], [], []>} : vector<8x16xbf16>, vector<16x8xbf16>, vector<8x8xf32> -> vector<8x8xf32>
    %20 = arith.index_cast %c1_i32 : i32 to index
    %c0_12 = arith.constant 0 : index
    %c0_13 = arith.constant 0 : index
    %21 = vector.load %arg4[%20, %c0_12, %c0_13] : memref<4x8x8xf32, #tpu.memory_space<vmem>>, vector<1x8x8xf32>
    %22 = vector.shape_cast %21 : vector<1x8x8xf32> to vector<8x8xf32>
    %23 = vector.shape_cast %19 : vector<8x8xf32> to vector<1x8x8xf32>
    tpu.vector_store %arg4[%20, %c0_12, %c0_13], %23 {strides = array<i32>} : memref<4x8x8xf32, #tpu.memory_space<vmem>>, vector<1x8x8xf32>,
    %c2_i32 = arith.constant 2 : i32
    %24 = arith.index_cast %c2_i32 : i32 to index
    %c0_14 = arith.constant 0 : index
    %c0_15 = arith.constant 0 : index
    %25 = vector.load %arg3[%24, %c0_14, %c0_15] : memref<4x16x16xf32, #tpu.memory_space<vmem>>, vector<1x16x16xf32>
    %26 = vector.shape_cast %25 : vector<1x16x16xf32> to vector<16x16xf32>
    %27 = arith.truncf %26 : vector<16x16xf32> to vector<16x16xbf16>
    %cst_16 = arith.constant dense<0.000000e+00> : vector<16x8xf32>
    %28 = tpu.matmul %27, %1, %cst_16 {dimension_numbers = #tpu.dot_dimension_numbers<[1], [0], [0], [1], [0, 0, 1, 1], [], []>} : vector<16x16xbf16>, vector<16x8xbf16>, vector<16x8xf32> -> vector<16x8xf32>
    %29 = arith.truncf %28 : vector<16x8xf32> to vector<16x8xbf16>
    %cst_17 = arith.constant dense<0.000000e+00> : vector<8x8xf32>
    %30 = tpu.matmul %0, %29, %cst_17 {dimension_numbers = #tpu.dot_dimension_numbers<[1], [0], [0], [1], [0, 0, 1, 1], [], []>} : vector<8x16xbf16>, vector<16x8xbf16>, vector<8x8xf32> -> vector<8x8xf32>
    %31 = arith.index_cast %c2_i32 : i32 to index
    %c0_18 = arith.constant 0 : index
    %c0_19 = arith.constant 0 : index
    %32 = vector.load %arg4[%31, %c0_18, %c0_19] : memref<4x8x8xf32, #tpu.memory_space<vmem>>, vector<1x8x8xf32>
    %33 = vector.shape_cast %32 : vector<1x8x8xf32> to vector<8x8xf32>
    %34 = vector.shape_cast %30 : vector<8x8xf32> to vector<1x8x8xf32>
    tpu.vector_store %arg4[%31, %c0_18, %c0_19], %34 {strides = array<i32>} : memref<4x8x8xf32, #tpu.memory_space<vmem>>, vector<1x8x8xf32>,
    %c3_i32 = arith.constant 3 : i32
    %35 = arith.index_cast %c3_i32 : i32 to index
    %c0_20 = arith.constant 0 : index
    %c0_21 = arith.constant 0 : index
    %36 = vector.load %arg3[%35, %c0_20, %c0_21] : memref<4x16x16xf32, #tpu.memory_space<vmem>>, vector<1x16x16xf32>
    %37 = vector.shape_cast %36 : vector<1x16x16xf32> to vector<16x16xf32>
    %38 = arith.truncf %37 : vector<16x16xf32> to vector<16x16xbf16>
    %cst_22 = arith.constant dense<0.000000e+00> : vector<16x8xf32>
    %39 = tpu.matmul %38, %1, %cst_22 {dimension_numbers = #tpu.dot_dimension_numbers<[1], [0], [0], [1], [0, 0, 1, 1], [], []>} : vector<16x16xbf16>, vector<16x8xbf16>, vector<16x8xf32> -> vector<16x8xf32>
    %40 = arith.truncf %39 : vector<16x8xf32> to vector<16x8xbf16>
    %cst_23 = arith.constant dense<0.000000e+00> : vector<8x8xf32>
    %41 = tpu.matmul %0, %40, %cst_23 {dimension_numbers = #tpu.dot_dimension_numbers<[1], [0], [0], [1], [0, 0, 1, 1], [], []>} : vector<8x16xbf16>, vector<16x8xbf16>, vector<8x8xf32> -> vector<8x8xf32>
    %42 = arith.index_cast %c3_i32 : i32 to index
    %c0_24 = arith.constant 0 : index
    %c0_25 = arith.constant 0 : index
    %43 = vector.load %arg4[%42, %c0_24, %c0_25] : memref<4x8x8xf32, #tpu.memory_space<vmem>>, vector<1x8x8xf32>
    %44 = vector.shape_cast %43 : vector<1x8x8xf32> to vector<8x8xf32>
    %45 = vector.shape_cast %41 : vector<8x8xf32> to vector<1x8x8xf32>
    tpu.vector_store %arg4[%42, %c0_24, %c0_25], %45 {strides = array<i32>} : memref<4x8x8xf32, #tpu.memory_space<vmem>>, vector<1x8x8xf32>,
    %c4_i32 = arith.constant 4 : i32
    return
  }
  func.func @transform_0(%arg0: i32) -> (i32, i32) {
    %c0_i32 = arith.constant 0 : i32
    %c0_i32_0 = arith.constant 0 : i32
    %c0_i32_1 = arith.constant 0 : i32
    return %c0_i32, %c0_i32_0 : i32, i32
  }
  func.func @transform_1(%arg0: i32) -> (i32, i32) {
    %c0_i32 = arith.constant 0 : i32
    %c0_i32_0 = arith.constant 0 : i32
    %c0_i32_1 = arith.constant 0 : i32
    return %c0_i32, %c0_i32_0 : i32, i32
  }
  func.func @transform_2(%arg0: i32) -> (i32, i32, i32) {
    %c0_i32 = arith.constant 0 : i32
    %c0_i32_0 = arith.constant 0 : i32
    %c0_i32_1 = arith.constant 0 : i32
    return %arg0, %c0_i32, %c0_i32_0 : i32, i32, i32
  }
  func.func @transform_3(%arg0: i32) -> (i32, i32, i32) {
    %c0_i32 = arith.constant 0 : i32
    %c0_i32_0 = arith.constant 0 : i32
    %c0_i32_1 = arith.constant 0 : i32
    return %arg0, %c0_i32, %c0_i32_0 : i32, i32, i32
  }
}

</mosaic_0001>

<bundles_post_ra>
// kernel: tpu_custom_call.1
= control target key start
LH: loop header
LB: loop body
LE: loop exit
PB: predicated region body
PF: predicated region fallthrough
CT: control target
= control target key end

     0   :  { %8 = vsyncpa [#allocation3], 0  ;;  %s1138_s0 = inlined_call_operand.vmem [shape: bf16[8,16], index: 0, kind: input, shape index: {}]   ;;  %s1139_s1 = inlined_call_operand.vmem [shape: bf16[16,8], index: 1, kind: input, shape index: {}]   ;;  %s1140_s2 = inlined_call_operand.hbm [shape: f32[8,16,16], index: 2, kind: input, shape index: {}]   ;;  %s1141_s3 = inlined_call_operand.hbm [shape: f32[8,8,8], index: 3, kind: output, shape index: {}]  }
   0x1   :  { %10 = vsyncpa [#allocation3 + $0x1], 0 }
   0x2   :  { %11 = vsyncpa [#allocation4], 0 }
   0x3   :  { %13 = vsyncpa [#allocation4 + $0x1], 0  ;;  %s931_s12 = smov 0   ;;  %s933_s13 = smov 0  }
   0x4   :  { %s935_s14 = smov 0   ;;  %s937_s15 = smov 0  }
   0x5 LB: > { %s952_s16 = sadd.s32 4294967295, %s901_s15   ;;  %s656_s17 = sadd.s32 4294967294, %s901_s15   ;;  %s901_s15 = sphi %s937_s15, %s1156_s15   ;;  %s897_s14 = sphi %s935_s14, %s1155_s14   ;;  %s893_s13 = sphi %s933_s13, %s1154_s13   ;;  %s889_s12 = sphi %s931_s12, %s1153_s12  }
   0x6   : > { %s956_s18 = sadd.s32 1, %s901_s15   ;;  %s68_s19 = sadd.s32 1, %s897_s14 }
   0x7   : > { %s65_s20 = ssub.s32 %s901_s15, %s956_s18  ;;  %p75_p0 = scmp.ne.s32.totalorder %s897_s14, %s893_s13 }
   0x8   : > { %p66_p1 = scmp.eq.s32.totalorder %s65_s20, 0  ;;  %p76_p2 = scmp.eq.s32.totalorder %s901_s15, 0 }
   0x9   : > { %p81_p3 = scmp.ne.s32.totalorder %s893_s13, %s889_s12  ;;  %p82_p4 = scmp.eq.s32.totalorder %s952_s16, 0 }
   0xa   : > { %s968_s21 = scalar_select %p66_p1, %s897_s14, %s68_s19  }
   0xb   : > { %p970_p5 = por %p76_p2, %p75_p0  ;;  %p974_p6 = por %p82_p4, %p81_p3 }
   0xc   : > { %p105_p7 = scmp.eq.s32.totalorder %s952_s16, 1  ;;  %p111_p8 = scmp.eq.s32.totalorder %s656_s17, 1 }
   0xd   : > { %s1145_s23 = scalar_select %p974_p6, 1, 0 }
   0xe   : > { %p768_p10 = scmp.lt.s32.totalorder %s901_s15, 2  ;;  %p981_p11 = por %p105_p7, %p75_p0 }
   0xf   : > { %p985_p12 = por %p111_p8, %p81_p3  ;;  %s137_s26 = sand.u32 1, %s897_s14  }
  0x10   : > { %s1146_s24 = scalar_select %p981_p11, 1, 0 }
  0x11   : > { %s1147_s25 = scalar_select %p985_p12, 1, 0 }
  0x12   : > { %s690_s27 = sshll.u32 %s901_s15, 10  ;;  %s659_s28 = sshll.u32 %s137_s26, 6 }
  0x13   : > { %s994_s4 = scalar_lea.hbm %s1140_s2, %s690_s27  ;;  %s141_s5 = scalar_lea.vmem [#allocation2], %s659_s28 }
  0x14   : > { %s149_s6 = sshll.u32 %s141_s5, 4  ;;  %p998_p13 = pnand %p768_p10, %p970_p5  ;;  %s1002_s6 = int_to_ptr.vmem [resolvable:$true] %s149_s6 }
  0x15   : > { %s1004_s8 = scalar_lea.sflag [#allocation3], %s137_s26  ;;  %s809_s9 = scalar_lea.hbm %s994_s4, 1024 }
  0x16   : > { %p810_p0 = scmp.ne.s32.totalorder %s994_s4, %s809_s9  ;;  %p811_p1 = pneg %p998_p13 }
  0x17   : > { %s814_s17 = scalar_lea.hbm %s1140_s2, 2048  ;;  %p815_p4 = scmp.lt.s32.totalorder %s994_s4, %s1140_s2 }
  0x18   : > { %p812_p2 = pnand %p811_p1, %p810_p0  ;;  %p816_p5 = scmp.lt.s32.totalorder %s814_s17, %s809_s9 }
  0x1a   : > { %p813_p3 = pneg %p812_p2  ;;  %p817_p7 = por %p816_p5, %p815_p4 }
  0x1c   : > { %p818_p8 = pnand %p817_p7, %p813_p3 }
  0x1e   : > { %821 = shalt.err (!%p818_p8)
}
  0x1f   : > { %s822_s22 = scalar_lea.vmem %s1002_s6, 1024  ;;  %s903_s26 = smov [#allocation2]  }
  0x20   : > { %p823_p10 = scmp.ne.s32.totalorder %s1002_s6, %s822_s22  ;;  %s827_s27 = sshll.u32 %s903_s26, 4  ;;  %s828_s27 = int_to_ptr.vmem [resolvable:$false] %s827_s27 }
  0x21   : > { %s829_s28 = scalar_lea.vmem %s828_s27, 2048  ;;  %p830_p2 = scmp.lt.s32.totalorder %s1002_s6, %s828_s27 }
  0x22   : > { %p825_p9 = pnand %p823_p10, %p811_p1  ;;  %p831_p12 = scmp.lt.s32.totalorder %s829_s28, %s822_s22 }
  0x24   : > { %p826_p0 = pneg %p825_p9  ;;  %p832_p11 = por %p831_p12, %p830_p2 }
  0x26   : > { %p833_p6 = pnand %p832_p11, %p826_p0 }
  0x28   : > { %836 = shalt.err (!%p833_p6)
}
  0x29   : > { %s904_s29 = smov 128   ;;  %s905_s30 = smov 8  }
  0x2a   : > { %763 = dma.hbm_to_vmem [thread:$0]  (!%p998_p13), %s994_s4, 1024, %s1002_s6, %s1004_s8, %s904_s29, %s904_s29, %s905_s30  }
  0x2b   : > { %p663_p9 = scmp.ge.s32.totalorder %s901_s15, 1  ;;  %p157_p1 = scmp.lt.s32.totalorder %s901_s15, 3 }
  0x2d   : > { %p158_p3 = pnand %p663_p9, %p157_p1 }
  0x2e   : > { %s1028_s5 = sand.u32 (!%p158_p3), 1, %s893_s13   ;;  %p1149_p6 = scmp.ne.s32.totalorder (!%p158_p3), %s1145_s23, 0 }
  0x2f   : > { %161 = sbr.rel (%p158_p3) target bundleno = 494 (0x1ee), region = 32  ;;  %s664_s9 = sshll.u32 (!%p158_p3), %s1028_s5, 6 }
  0x30   : > { %s164_s10 = scalar_lea.sflag (!%p158_p3), [#allocation3], %s1028_s5  ;;  %s1032_s11 = scalar_lea.vmem (!%p158_p3), [#allocation2], %s664_s9 }
  0x34   : > { %880 = dma.done.wait (%p1149_p6), %s164_s10, 1024  }
  0x35   : > { %882 = vsyncadd (%p1149_p6), %s164_s10, 4294966272  ;;  %v906_v0 = vmov 0.0   ;;  %vm907_vm0 = vmmov 0   ;;  %v808_v1 = vld [vmem:[%s1139_s1] sm:$0xff]   ;;  %v197_v3 = vld [vmem:[%s1032_s11 + $0x8] sm:$0xff]  ;;  %vm205_vm1 = vcmask 130048  }
  0x36   : > { %708 = vmatprep.subr.bf16.mxu0 %v906_v0  ;;  %710 = vmatprep.mubr.msk.bf16.mxu0 %vm907_vm0, %v906_v0  ;;  %v196_v2 = vld [vmem:[%s1032_s11] sm:$0xff]  ;;  %v669_v5 = vld [vmem:[%s1032_s11 + $0x10] sm:$0xff]  ;;  %v670_v6 = vld [vmem:[%s1032_s11 + $0x18] sm:$0xff]  ;;  %s665_s8 = sshll.u32 %s1028_s5, 5  ;;  %vm294_vm2 = vcmask 64512   ;;  %s691_s20 = sshll.u32 %s952_s16, 9 }
  0x37   : > { %714 = vmatprep.subr.bf16.mxu1 %v906_v0  ;;  %716 = vmatprep.mubr.msk.bf16.mxu1 %vm907_vm0, %v906_v0  ;;  %v198_v4 = vpack.c.bf16 %v197_v3, %v196_v2  ;;  %v299_v7 = vpack.c.bf16 %v670_v6, %v669_v5  ;;  %v674_v8 = vld [vmem:[%s1032_s11 + $0x20] sm:$0xff]  ;;  %v675_v9 = vld [vmem:[%s1032_s11 + $0x28] sm:$0xff]  ;;  %v679_v11 = vld [vmem:[%s1032_s11 + $0x30] sm:$0xff]  ;;  %s189_s17 = scalar_lea.vmem [#allocation5], %s665_s8  ;;  %s1094_s27 = scalar_lea.hbm %s1141_s3, %s691_s20 }
  0x38   : > { %709 = vmatpush3.bf16.msra.mxu0 %v808_v1  ;;  %v390_v10 = vpack.c.bf16 %v675_v9, %v674_v8  ;;  %v680_v12 = vld [vmem:[%s1032_s11 + $0x38] sm:$0xff]  ;;  %v193_v19 = vld [vmem:[%s1138_s0] sm:$0xf]  ;;  %s583_s19 = sshll.u32 %s189_s17, 4  ;;  %s570_s28 = scalar_lea.sflag [#allocation4], %s1028_s5  ;;  %s1089_s19 = int_to_ptr.vmem [resolvable:$true] %s583_s19 }
  0x39   : > { %720 = vmatprep.subr.bf16.mxu0 %v906_v0  ;;  %v481_v13 = vpack.c.bf16 %v680_v12, %v679_v11  ;;  %s837_s29 = scalar_lea.vmem %s1089_s19, 512  ;;  %p1150_p12 = scmp.ne.s32.totalorder %s1146_s24, 0 }
  0x3a   : > { %p838_p11 = scmp.ne.s32.totalorder %s1089_s19, %s837_s29  ;;  %s908_s16 = smov [#allocation5]  }
  0x3b   : > { %711 = vmatmul.mubr.msk.bf16.vlgmr.msra.gmra.mxu0 %vm205_vm1, %v198_v4  ;;  %s841_s30 = sshll.u32 %s908_s16, 4  ;;  %s842_s30 = int_to_ptr.vmem [resolvable:$false] %s841_s30 }
  0x3c   : > { %721 = vmatpush3.bf16.msra.mxu0 %v808_v1  ;;  %722 = vmatprep.mubr.msk.bf16.mxu0 %vm907_vm0, %v906_v0  ;;  %p839_p13 = pnand %p838_p11, %p1150_p12  ;;  %s843_s9 = scalar_lea.vmem %s842_s30, 1024 }
  0x3d   : > { %732 = vmatprep.subr.bf16.mxu0 %v906_v0  ;;  %p844_p5 = scmp.lt.s32.totalorder %s1089_s19, %s842_s30  ;;  %p845_p7 = scmp.lt.s32.totalorder %s843_s9, %s837_s29 }
  0x3e   : > { %p840_p4 = pneg %p839_p13 }
  0x3f   : > { %p846_p8 = por %p845_p7, %p844_p5 }
  0x41   : > { %p847_p10 = pnand %p846_p8, %p840_p4 }
  0x43   : > { %723 = vmatmul.mubr.msk.bf16.vlgmr.msra.gmra.mxu0 %vm205_vm1, %v299_v7 }
  0x44   : > { %733 = vmatpush3.bf16.msra.mxu0 %v808_v1  ;;  %734 = vmatprep.mubr.msk.bf16.mxu0 %vm907_vm0, %v906_v0 }
  0x45   : > { %744 = vmatprep.subr.bf16.mxu0 %v906_v0 }
  0x4b   : > { %735 = vmatmul.mubr.msk.bf16.vlgmr.msra.gmra.mxu0 %vm205_vm1, %v390_v10 }
  0x4c   : > { %745 = vmatpush3.bf16.msra.mxu0 %v808_v1  ;;  %746 = vmatprep.mubr.msk.bf16.mxu0 %vm907_vm0, %v906_v0 }
  0x53   : > { %747 = vmatmul.mubr.msk.bf16.vlgmr.msra.gmra.mxu0 %vm205_vm1, %v481_v13 }
  0xfb   : > { %v243_v14 = vpop.f32.mrf.mxu0 }
  0xfd   : > { %v712_v15 = vpop.f32.mrf.mxu0 }
  0xff   : > { %v246_v16 = vpop.f32.mrf.mxu0 }
 0x100   : > { %v250_v17 = vpack.c.bf16 %v246_v16, %v243_v14 }
 0x101   : > { %v713_v18 = vpop.f32.mrf.mxu0 }
 0x102   : > { %715 = vmatpush3.bf16.msra.mxu1 %v250_v17 }
 0x103   : > { %v337_v20 = vpop.f32.mrf.mxu0  ;;  %726 = vmatprep.subr.bf16.mxu1 %v906_v0 }
 0x105   : > { %717 = vmatmul.mubr.msk.bf16.vlgmr.msra.gmra.mxu1 %vm205_vm1, %v193_v19  ;;  %v724_v21 = vpop.f32.mrf.mxu0 }
 0x106   : > { %728 = vmatprep.mubr.msk.bf16.mxu1 %vm907_vm0, %v906_v0 }
 0x107   : > { %v340_v22 = vpop.f32.mrf.mxu0 }
 0x108   : > { %v344_v23 = vpack.c.bf16 %v340_v22, %v337_v20 }
 0x109   : > { %v725_v24 = vpop.f32.mrf.mxu0 }
 0x10a   : > { %727 = vmatpush3.bf16.msra.mxu1 %v344_v23 }
 0x10b   : > { %v428_v25 = vpop.f32.mrf.mxu0  ;;  %738 = vmatprep.subr.bf16.mxu1 %v906_v0 }
 0x10d   : > { %729 = vmatmul.mubr.msk.bf16.vlgmr.msra.gmra.mxu1 %vm205_vm1, %v193_v19  ;;  %v736_v26 = vpop.f32.mrf.mxu0 }
 0x10e   : > { %740 = vmatprep.mubr.msk.bf16.mxu1 %vm907_vm0, %v906_v0 }
 0x10f   : > { %v431_v27 = vpop.f32.mrf.mxu0 }
 0x110   : > { %v435_v28 = vpack.c.bf16 %v431_v27, %v428_v25 }
 0x111   : > { %v737_v29 = vpop.f32.mrf.mxu0 }
 0x112   : > { %739 = vmatpush3.bf16.msra.mxu1 %v435_v28 }
 0x113   : > { %v519_v30 = vpop.f32.mrf.mxu0  ;;  %750 = vmatprep.subr.bf16.mxu1 %v906_v0 }
 0x115   : > { %741 = vmatmul.mubr.msk.bf16.vlgmr.msra.gmra.mxu1 %vm205_vm1, %v193_v19  ;;  %v748_v31 = vpop.f32.mrf.mxu0 }
 0x116   : > { %752 = vmatprep.mubr.msk.bf16.mxu1 %vm907_vm0, %v906_v0 }
 0x117   : > { %v522_v32 = vpop.f32.mrf.mxu0 }
 0x118   : > { %v526_v33 = vpack.c.bf16 %v522_v32, %v519_v30 }
 0x119   : > { %v749_v34 = vpop.f32.mrf.mxu0 }
 0x11a   : > { %751 = vmatpush3.bf16.msra.mxu1 %v526_v33 }
 0x11d   : > { %753 = vmatmul.mubr.msk.bf16.vlgmr.msra.gmra.mxu1 %vm205_vm1, %v193_v19 }
 0x1c5   : > { %v288_v35 = vpop.f32.mrf.mxu1 }
 0x1c6   : > { %295 = vst.msk [vmem:[%s189_s17] sm:$0xff] %vm294_vm2, %v288_v35 }
 0x1c7   : > { %v718_v36 = vpop.f32.mrf.mxu1 }
 0x1c9   : > { %v291_v37 = vpop.f32.mrf.mxu1 }
 0x1cb   : > { %v719_v38 = vpop.f32.mrf.mxu1 }
 0x1cd   : > { %v379_v39 = vpop.f32.mrf.mxu1 }
 0x1ce   : > { %673 = vst.msk [vmem:[%s189_s17 + $0x8] sm:$0xff] %vm294_vm2, %v379_v39 }
 0x1cf   : > { %v730_v40 = vpop.f32.mrf.mxu1 }
 0x1d1   : > { %v382_v41 = vpop.f32.mrf.mxu1 }
 0x1d3   : > { %v731_v42 = vpop.f32.mrf.mxu1 }
 0x1d5   : > { %v470_v43 = vpop.f32.mrf.mxu1 }
 0x1d6   : > { %678 = vst.msk [vmem:[%s189_s17 + $0x10] sm:$0xff] %vm294_vm2, %v470_v43 }
 0x1d7   : > { %v742_v44 = vpop.f32.mrf.mxu1 }
 0x1d9   : > { %v473_v45 = vpop.f32.mrf.mxu1 }
 0x1db   : > { %v743_v46 = vpop.f32.mrf.mxu1 }
 0x1dd   : > { %v561_v47 = vpop.f32.mrf.mxu1 }
 0x1de   : > { %683 = vst.msk [vmem:[%s189_s17 + $0x18] sm:$0xff] %vm294_vm2, %v561_v47 }
 0x1df   : > { %v754_v48 = vpop.f32.mrf.mxu1 }
 0x1e0   : > { %850 = shalt.err (!%p847_p10)
}
 0x1e1   : > { %s851_s10 = scalar_lea.hbm %s1094_s27, 512  ;;  %s855_s6 = scalar_lea.hbm %s1141_s3, 1024 }
 0x1e2   : > { %p852_p0 = scmp.ne.s32.totalorder %s1094_s27, %s851_s10  ;;  %p856_p1 = scmp.lt.s32.totalorder %s1094_s27, %s1141_s3 }
 0x1e3   : > { %p857_p3 = scmp.lt.s32.totalorder %s855_s6, %s851_s10 }
 0x1e4   : > { %p853_p2 = pnand %p852_p0, %p1150_p12 }
 0x1e5   : > { %p858_p6 = por %p857_p3, %p856_p1 }
 0x1e6   : > { %p854_p9 = pneg %p853_p2 }
 0x1e8   : > { %p859_p11 = pnand %p858_p6, %p854_p9 }
 0x1ea   : > { %862 = shalt.err (!%p859_p11)
}
 0x1eb   : > { %s909_s8 = smov 128   ;;  %s910_s17 = smov 8   ;;  %v564_v49 = vpop.f32.mrf.mxu1 }
 0x1ec   : > { %758 = dma.vmem_to_hbm [thread:$0]  (%p1150_p12), %s1089_s19, 512, %s1094_s27, %s570_s28, %s909_s8, %s909_s8, %s910_s17  }
 0x1ed   : > { %v755_v50 = vpop.f32.mrf.mxu1 }
 0x1ee PF: > { %s598_s20 = sand.u32 1, %s889_s12   ;;  %p1151_p13 = scmp.ne.s32.totalorder %s1147_s25, 0 }
 0x1ef   : > { %p1152_p4 = scmp.ge.s32.totalorder %s901_s15, 2  ;;  %s599_s22 = scalar_lea.sflag [#allocation4], %s598_s20 }
 0x1f1   : > { %p765_p5 = pnand %p1152_p4, %p1151_p13 }
 0x1f3   : > { %p766_p7 = pneg %p765_p5 }
 0x1f5   : > { %884 = dma.done.wait (%p766_p7), %s599_s22, 512  }
 0x1f6   : > { %886 = vsyncadd (%p766_p7), %s599_s22, 4294966784  ;;  %p16_p12 = scmp.ge.s32.totalorder %s956_s18, 4   ;;  %s1153_s12 = smov %s893_s13 }
 0x1f7   : > { %s1154_s13 = smov %s897_s14  ;;  %s1155_s14 = smov %s968_s21 }
 0x1f8   : > { %s1156_s15 = smov %s956_s18  ;;  %18 = sbr.rel (!%p16_p12) target bundleno = 5 (0x5), region = 83 }
 0x1fd   :  { %604 = vsyncpa [#allocation3], 1 }
 0x1fe   :  { %606 = vsyncpa [#allocation3 + $0x1], 1 }
 0x1ff   :  { %607 = vsyncpa [#allocation4], 1 }
 0x200   :  { %609 = vsyncpa [#allocation4 + $0x1], 1 }

</bundles_post_ra>
